<compile_context>
chip_gen: v7x
topology: tpu7x:2x2x1
jax: 0.10.0
libtpu: 0.0.40
codegen_flags: <defaults>
</compile_context>

<pallas_src>
import functools
import math

import jax
import jax.numpy as jnp
from jax import lax
from jax.experimental import pallas as pl
from jax.experimental.pallas import tpu as pltpu


def _round_up(x, m):
    return ((x + m - 1) // m) * m


def _choose_seq_tiles(s, batch):
    """Returns (padded_S, tq, tk).  Prefers 256-multiples (v6e/v7x MXU width)."""
    if s <= 256:
        sp = _round_up(s, 8)
        tq = tk = sp
    else:
        sp = _round_up(s, 256)
        tq = 256
        tk = 512 if sp % 512 == 0 else 256
    # v7x shards the "parallel" grid axes over 2 TensorCores: make sure
    # batch * num_q_tiles >= 2 so neither core sits idle.
    if batch * (sp // tq) < 2 and tq >= 16 and (tq // 2) % 8 == 0:
        tq //= 2
    return sp, tq, tk


# ---------------------------------------------------------------------------
# Fused kernel: xw = x @ W (prologue) + flash-style bilinear attention.
#   scores = xw @ x^T ; attn = softmax(scores) ; out = attn @ x
# ---------------------------------------------------------------------------
def _attn_kernel(xq_ref, w_ref, xkv_ref, o_ref, xw_sc, m_sc, l_sc, acc_sc,
                 *, mm_dtype, seq_len, tk, mask_keys):
    ki = pl.program_id(2)

    @pl.when(ki == 0)
    def _():
        m_sc[...] = jnp.full_like(m_sc, -jnp.inf)
        l_sc[...] = jnp.zeros_like(l_sc)
        acc_sc[...] = jnp.zeros_like(acc_sc)
        # Fused xw = (x q-tile) @ W, computed once per (b, q-tile) and kept in
        # VMEM for all kv steps.  W is resident (constant index_map).
        xw_sc[...] = jnp.dot(
            xq_ref[0].astype(mm_dtype), w_ref[...],
            preferred_element_type=jnp.float32,
        ).astype(mm_dtype)

    xk = xkv_ref[0].astype(mm_dtype)  # (TK, Hp) — doubles as K and V

    # scores = xw @ xk^T, contracting H directly (no explicit transpose copy).
    s = lax.dot_general(
        xw_sc[...], xk,
        dimension_numbers=(((1,), (1,)), ((), ())),
        preferred_element_type=jnp.float32,
    )  # (TQ, TK) f32

    if mask_keys:
        # Zero-padded key rows give score 0, which is not neutral under
        # softmax: push padded keys to a large negative value instead.
        key_pos = ki * tk + lax.broadcasted_iota(jnp.int32, s.shape, 1)
        s = jnp.where(key_pos < seq_len, s, -1e30)

    # Online softmax (exp kept in f32; bf16 exp is a v6e/v7x-only micro-opt).
    m_prev = m_sc[...]
    m_new = jnp.maximum(m_prev, jnp.max(s, axis=-1, keepdims=True))
    alpha = jnp.exp(m_prev - m_new)
    p = jnp.exp(s - m_new)  # unnormalized probs, f32
    l_sc[...] = alpha * l_sc[...] + jnp.sum(p, axis=-1, keepdims=True)
    acc_sc[...] = alpha * acc_sc[...] + jnp.dot(
        p.astype(mm_dtype), xk, preferred_element_type=jnp.float32
    )
    m_sc[...] = m_new

    @pl.when(ki == pl.num_programs(2) - 1)
    def _():
        # Deferred normalization: exact divide, once per q-tile (off the
        # per-step critical path, so no reason to use the approx reciprocal).
        o_ref[0] = (acc_sc[...] / l_sc[...]).astype(o_ref.dtype)


def bilinear_attention(x, weight, *, matmul_dtype=jnp.bfloat16):
    """softmax(x @ W @ x^T) @ x with a fused flash-style Pallas kernel.

    matmul_dtype: dtype of the MXU operands (xw, K/V tile, probabilities).
    Accumulation and softmax statistics are always f32.
    """
    B, S, H = x.shape
    assert weight.shape == (H, H)
    mm_dtype = jnp.dtype(matmul_dtype)

    # Pad the hidden dim to a lane-dense multiple of 128 (mathematically exact:
    # zero hidden columns contribute 0 to both contractions) and the sequence
    # dim up to the chosen tiles (padded keys are masked inside the kernel).
    Hp = _round_up(H, 128)
    Sp, tq, tk = _choose_seq_tiles(S, B)

    x_p = x
    if Hp != H or Sp != S:
        x_p = jnp.pad(x, ((0, 0), (0, Sp - S), (0, Hp - H)))
    w_p = weight
    if Hp != H:
        w_p = jnp.pad(weight, ((0, Hp - H), (0, Hp - H)))
    w_p = w_p.astype(mm_dtype)

    nq = Sp // tq
    nk = Sp // tk

    isz = jnp.dtype(x.dtype).itemsize
    mm_isz = mm_dtype.itemsize
    vmem_est = (
        2 * (tq * Hp + tk * Hp + tq * Hp) * isz   # double-buffered x_q, x_kv, out
        + 2 * Hp * Hp * mm_isz                    # W (pipeline allocates 2 bufs)
        + tq * Hp * mm_isz                        # xw scratch
        + (tq * Hp + 2 * tq) * 4                  # f32 acc / m / l scratch
        + 3 * tq * tk * 4                         # in-kernel s / p temporaries
    )
    # 48 MiB cap leaves headroom on v7x (64 MiB physical); v5e/v6e have 128 MiB.
    vmem_limit = int(min(48 * 2**20, max(16 * 2**20, 2 * vmem_est)))

    kernel = functools.partial(
        _attn_kernel,
        mm_dtype=mm_dtype,
        seq_len=S,
        tk=tk,
        mask_keys=(Sp != S),
    )

    out_p = pl.pallas_call(
        kernel,
        out_shape=jax.ShapeDtypeStruct((B, Sp, Hp), x.dtype),
        grid_spec=pltpu.PrefetchScalarGridSpec(
            num_scalar_prefetch=0,
            grid=(B, nq, nk),
            in_specs=[
                pl.BlockSpec((1, tq, Hp), lambda b, qi, ki: (b, qi, 0)),  # x (Q)
                pl.BlockSpec((Hp, Hp), lambda b, qi, ki: (0, 0)),         # W resident
                pl.BlockSpec((1, tk, Hp), lambda b, qi, ki: (b, ki, 0)),  # x (K/V)
            ],
            out_specs=pl.BlockSpec((1, tq, Hp), lambda b, qi, ki: (b, qi, 0)),
            scratch_shapes=[
                pltpu.VMEM((tq, Hp), mm_dtype),      # xw tile (x @ W)
                pltpu.VMEM((tq, 1), jnp.float32),    # running max m
                pltpu.VMEM((tq, 1), jnp.float32),    # running denom l
                pltpu.VMEM((tq, Hp), jnp.float32),   # output accumulator
            ],
        ),
        compiler_params=pltpu.CompilerParams(
            dimension_semantics=("parallel", "parallel", "arbitrary"),
            vmem_limit_bytes=vmem_limit,
        ),
        cost_estimate=pl.CostEstimate(
            flops=int(2 * B * Sp * Hp * Hp + 4 * B * Sp * Sp * Hp),
            transcendentals=int(B * Sp * Sp),
            bytes_accessed=int((B * Sp * Hp * (nq + 2) + Hp * Hp) * isz),
        ),
    )(x_p, w_p, x_p)

    # TODO(synk): dropout on the attention matrix is stochastic in training;
    # implemented as identity (PyTorch eval-mode semantics).  Training parity
    # would use pltpu.prng_seed + pltpu.prng_random_bits for the mask plus a
    # 1/(1-p) rescale.
    if Sp != S or Hp != H:
        return out_p[:, :S, :H]
    return out_p


def init_weight(key, hidden):
    # xavier_uniform_: bound = sqrt(6 / (fan_in + fan_out)) = sqrt(6 / (2*H))
    bound = math.sqrt(6.0 / (hidden + hidden))
    return jax.random.uniform(key, (hidden, hidden), jnp.float32,
                              minval=-bound, maxval=bound)


def reference(x, weight):
    scores = jnp.einsum("bsh,hk,btk->bst", x, weight, x)
    attn = jax.nn.softmax(scores, axis=-1)
    return jnp.einsum("bst,bth->bsh", attn, x)


if __name__ == "__main__":
    key = jax.random.PRNGKey(0)
    kx, kw, kx2 = jax.random.split(key, 3)

    # Case 1: aligned small shape.
    B, S, H = 2, 8, 32
    x = jax.random.normal(kx, (B, S, H), jnp.float32)
    W = init_weight(kw, H)
    ref = reference(x, W)

    # Near-exact path: f32 MXU operands, exact normalization.
    out_f32 = jax.block_until_ready(bilinear_attention(x, W, matmul_dtype=jnp.float32))
    assert out_f32.shape == (B, S, H)
    assert jnp.allclose(out_f32, ref, atol=1e-2, rtol=1e-2), "f32 path mismatch"

    # Default fast path: bf16 MXU operands.  bf16 logits carry ~1e-2 absolute
    # error through exp/softmax, so the tolerance vs the f32 reference is loose.
    out_bf16 = jax.block_until_ready(bilinear_attention(x, W))
    assert out_bf16.shape == (B, S, H)
    assert jnp.allclose(out_bf16, ref, atol=1e-1, rtol=1e-1), "bf16 path mismatch"

    # Case 2: non-divisible S (exercises sequence padding + key masking) and
    # B == 1 (exercises the q-tile split for the 2-TC parallel axes).
    B2, S2, H2 = 1, 10, 32
    x2 = jax.random.normal(kx2, (B2, S2, H2), jnp.float32)
    ref2 = reference(x2, W)
    out2 = jax.block_until_ready(bilinear_attention(x2, W, matmul_dtype=jnp.float32))
    assert out2.shape == (B2, S2, H2)
    assert jnp.allclose(out2, ref2, atol=1e-2, rtol=1e-2), "padded-S path mismatch"

    print("KERNEL_OK")
</pallas_src>

<mosaic_0001>
module attributes {stable_mosaic.version = 11 : i64} {
  func.func @_attn_kernel(%arg0: i32, %arg1: i32, %arg2: i32, %arg3: memref<1x8x128xf32, #tpu.memory_space<vmem>>, %arg4: memref<128x128xf32, #tpu.memory_space<vmem>>, %arg5: memref<1x8x128xf32, #tpu.memory_space<vmem>>, %arg6: memref<1x8x128xf32, #tpu.memory_space<vmem>>, %arg7: memref<8x128xf32, #tpu.memory_space<vmem>>, %arg8: memref<8x1xf32, #tpu.memory_space<vmem>>, %arg9: memref<8x1xf32, #tpu.memory_space<vmem>>, %arg10: memref<8x128xf32, #tpu.memory_space<vmem>>) attributes {dimension_semantics = [#tpu.dimension_semantics<parallel>, #tpu.dimension_semantics<parallel>, #tpu.dimension_semantics<arbitrary>], iteration_bounds = array<i64: 2, 1, 1>, scalar_prefetch = 0 : i64, scratch_operands = 4 : i64, tpu.core_type = #tpu.core_type<tc>, window_params = [{transform_indices = @transform_0, window_bounds = array<i64: 1, 8, 128>}, {pipeline_mode = #tpu.pipeline_mode<synchronous>, transform_indices = @transform_1, window_bounds = array<i64: 128, 128>}, {transform_indices = @transform_2, window_bounds = array<i64: 1, 8, 128>}, {transform_indices = @transform_3, window_bounds = array<i64: 1, 8, 128>}]} {
    %c0_i32 = arith.constant 0 : i32
    %0 = arith.cmpi eq, %arg2, %c0_i32 : i32
    %1 = arith.extui %0 : i1 to i32
    %c0_i32_0 = arith.constant 0 : i32
    %2 = arith.cmpi ne, %1, %c0_i32_0 : i32
    scf.if %2 {
      %cst_22 = arith.constant 0xFF800000 : f32
      %32 = vector.broadcast %cst_22 : f32 to vector<8x1xf32>
      %c0_23 = arith.constant 0 : index
      %c0_24 = arith.constant 0 : index
      %33 = vector.load %arg8[%c0_23, %c0_24] : memref<8x1xf32, #tpu.memory_space<vmem>>, vector<8x1xf32>
      tpu.vector_store %arg8[%c0_23, %c0_24], %32 {strides = array<i32>} : memref<8x1xf32, #tpu.memory_space<vmem>>, vector<8x1xf32>,
      %cst_25 = arith.constant 0.000000e+00 : f32
      %34 = vector.broadcast %cst_25 : f32 to vector<8x1xf32>
      %c0_26 = arith.constant 0 : index
      %c0_27 = arith.constant 0 : index
      %35 = vector.load %arg9[%c0_26, %c0_27] : memref<8x1xf32, #tpu.memory_space<vmem>>, vector<8x1xf32>
      tpu.vector_store %arg9[%c0_26, %c0_27], %34 {strides = array<i32>} : memref<8x1xf32, #tpu.memory_space<vmem>>, vector<8x1xf32>,
      %cst_28 = arith.constant 0.000000e+00 : f32
      %36 = vector.broadcast %cst_28 : f32 to vector<8x128xf32>
      %c0_29 = arith.constant 0 : index
      %c0_30 = arith.constant 0 : index
      %37 = vector.load %arg10[%c0_29, %c0_30] : memref<8x128xf32, #tpu.memory_space<vmem>>, vector<8x128xf32>
      tpu.vector_store %arg10[%c0_29, %c0_30], %36 {strides = array<i32>} : memref<8x128xf32, #tpu.memory_space<vmem>>, vector<8x128xf32>,
      %c0_31 = arith.constant 0 : index
      %c0_32 = arith.constant 0 : index
      %c0_33 = arith.constant 0 : index
      %38 = vector.load %arg3[%c0_31, %c0_32, %c0_33] : memref<1x8x128xf32, #tpu.memory_space<vmem>>, vector<1x8x128xf32>
      %39 = vector.shape_cast %38 : vector<1x8x128xf32> to vector<8x128xf32>
      %c0_34 = arith.constant 0 : index
      %c0_35 = arith.constant 0 : index
      %40 = vector.load %arg4[%c0_34, %c0_35] : memref<128x128xf32, #tpu.memory_space<vmem>>, vector<128x128xf32>
      %cst_36 = arith.constant dense<0.000000e+00> : vector<8x128xf32>
      %41 = tpu.matmul %39, %40, %cst_36 {dimension_numbers = #tpu.dot_dimension_numbers<[1], [0], [0], [1], [0, 0, 1, 1], [], []>} : vector<8x128xf32>, vector<128x128xf32>, vector<8x128xf32> -> vector<8x128xf32>
      %c0_37 = arith.constant 0 : index
      %c0_38 = arith.constant 0 : index
      %42 = vector.load %arg7[%c0_37, %c0_38] : memref<8x128xf32, #tpu.memory_space<vmem>>, vector<8x128xf32>
      tpu.vector_store %arg7[%c0_37, %c0_38], %41 {strides = array<i32>} : memref<8x128xf32, #tpu.memory_space<vmem>>, vector<8x128xf32>,
    } else {
    }
    %c0 = arith.constant 0 : index
    %c0_1 = arith.constant 0 : index
    %c0_2 = arith.constant 0 : index
    %3 = vector.load %arg5[%c0, %c0_1, %c0_2] : memref<1x8x128xf32, #tpu.memory_space<vmem>>, vector<1x8x128xf32>
    %4 = vector.shape_cast %3 : vector<1x8x128xf32> to vector<8x128xf32>
    %c0_3 = arith.constant 0 : index
    %c0_4 = arith.constant 0 : index
    %5 = vector.load %arg7[%c0_3, %c0_4] : memref<8x128xf32, #tpu.memory_space<vmem>>, vector<8x128xf32>
    %cst = arith.constant dense<0.000000e+00> : vector<8x8xf32>
    %6 = tpu.matmul %5, %4, %cst {dimension_numbers = #tpu.dot_dimension_numbers<[1], [1], [0], [0], [0, 0, 1, 0], [], []>} : vector<8x128xf32>, vector<8x128xf32>, vector<8x8xf32> -> vector<8x8xf32>
    %c0_5 = arith.constant 0 : index
    %c0_6 = arith.constant 0 : index
    %7 = vector.load %arg8[%c0_5, %c0_6] : memref<8x1xf32, #tpu.memory_space<vmem>>, vector<8x1xf32>
    %cst_7 = arith.constant dense<0xFF800000> : vector<8xf32>
    %8 = vector.multi_reduction <maximumf>, %6, %cst_7 [1] : vector<8x8xf32> to vector<8xf32>
    %9 = vector.shape_cast %8 : vector<8xf32> to vector<8x1xf32>
    %10 = arith.maximumf %7, %9 : vector<8x1xf32>
    %11 = arith.subf %7, %10 : vector<8x1xf32>
    %12 = math.exp %11 : vector<8x1xf32>
    %13 = vector.broadcast %10 : vector<8x1xf32> to vector<8x8xf32>
    %14 = arith.subf %6, %13 : vector<8x8xf32>
    %15 = math.exp %14 : vector<8x8xf32>
    %c0_8 = arith.constant 0 : index
    %c0_9 = arith.constant 0 : index
    %16 = vector.load %arg9[%c0_8, %c0_9] : memref<8x1xf32, #tpu.memory_space<vmem>>, vector<8x1xf32>
    %17 = arith.mulf %12, %16 : vector<8x1xf32>
    %cst_10 = arith.constant dense<0.000000e+00> : vector<8xf32>
    %18 = vector.multi_reduction <add>, %15, %cst_10 [1] : vector<8x8xf32> to vector<8xf32>
    %19 = vector.shape_cast %18 : vector<8xf32> to vector<8x1xf32>
    %20 = arith.addf %17, %19 : vector<8x1xf32>
    %c0_11 = arith.constant 0 : index
    %c0_12 = arith.constant 0 : index
    %21 = vector.load %arg9[%c0_11, %c0_12] : memref<8x1xf32, #tpu.memory_space<vmem>>, vector<8x1xf32>
    tpu.vector_store %arg9[%c0_11, %c0_12], %20 {strides = array<i32>} : memref<8x1xf32, #tpu.memory_space<vmem>>, vector<8x1xf32>,
    %c0_13 = arith.constant 0 : index
    %c0_14 = arith.constant 0 : index
    %22 = vector.load %arg10[%c0_13, %c0_14] : memref<8x128xf32, #tpu.memory_space<vmem>>, vector<8x128xf32>
    %23 = vector.broadcast %12 : vector<8x1xf32> to vector<8x128xf32>
    %24 = arith.mulf %23, %22 : vector<8x128xf32>
    %cst_15 = arith.constant dense<0.000000e+00> : vector<8x128xf32>
    %25 = tpu.matmul %15, %4, %cst_15 {dimension_numbers = #tpu.dot_dimension_numbers<[1], [0], [0], [1], [0, 0, 1, 1], [], []>} : vector<8x8xf32>, vector<8x128xf32>, vector<8x128xf32> -> vector<8x128xf32>
    %26 = arith.addf %24, %25 : vector<8x128xf32>
    %c0_16 = arith.constant 0 : index
    %c0_17 = arith.constant 0 : index
    %27 = vector.load %arg10[%c0_16, %c0_17] : memref<8x128xf32, #tpu.memory_space<vmem>>, vector<8x128xf32>
    tpu.vector_store %arg10[%c0_16, %c0_17], %26 {strides = array<i32>} : memref<8x128xf32, #tpu.memory_space<vmem>>, vector<8x128xf32>,
    %c0_18 = arith.constant 0 : index
    %c0_19 = arith.constant 0 : index
    %28 = vector.load %arg8[%c0_18, %c0_19] : memref<8x1xf32, #tpu.memory_space<vmem>>, vector<8x1xf32>
    tpu.vector_store %arg8[%c0_18, %c0_19], %10 {strides = array<i32>} : memref<8x1xf32, #tpu.memory_space<vmem>>, vector<8x1xf32>,
    %c0_i32_20 = arith.constant 0 : i32
    %29 = arith.cmpi eq, %arg2, %c0_i32_20 : i32
    %30 = arith.extui %29 : i1 to i32
    %c0_i32_21 = arith.constant 0 : i32
    %31 = arith.cmpi ne, %30, %c0_i32_21 : i32
    scf.if %31 {
      %c0_22 = arith.constant 0 : index
      %c0_23 = arith.constant 0 : index
      %32 = vector.load %arg10[%c0_22, %c0_23] : memref<8x128xf32, #tpu.memory_space<vmem>>, vector<8x128xf32>
      %c0_24 = arith.constant 0 : index
      %c0_25 = arith.constant 0 : index
      %33 = vector.load %arg9[%c0_24, %c0_25] : memref<8x1xf32, #tpu.memory_space<vmem>>, vector<8x1xf32>
      %34 = vector.broadcast %33 : vector<8x1xf32> to vector<8x128xf32>
      %35 = arith.divf %32, %34 : vector<8x128xf32>
      %c0_26 = arith.constant 0 : index
      %c0_27 = arith.constant 0 : index
      %c0_28 = arith.constant 0 : index
      %36 = vector.load %arg6[%c0_26, %c0_27, %c0_28] : memref<1x8x128xf32, #tpu.memory_space<vmem>>, vector<1x8x128xf32>
      %37 = vector.shape_cast %36 : vector<1x8x128xf32> to vector<8x128xf32>
      %38 = vector.shape_cast %35 : vector<8x128xf32> to vector<1x8x128xf32>
      tpu.vector_store %arg6[%c0_26, %c0_27, %c0_28], %38 {strides = array<i32>} : memref<1x8x128xf32, #tpu.memory_space<vmem>>, vector<1x8x128xf32>,
    } else {
    }
    return
  }
  func.func @transform_0(%arg0: i32, %arg1: i32, %arg2: i32) -> (i32, i32, i32) {
    %c0_i32 = arith.constant 0 : i32
    %c0_i32_0 = arith.constant 0 : i32
    return %arg0, %arg1, %c0_i32 : i32, i32, i32
  }
  func.func @transform_1(%arg0: i32, %arg1: i32, %arg2: i32) -> (i32, i32) {
    %c0_i32 = arith.constant 0 : i32
    %c0_i32_0 = arith.constant 0 : i32
    %c0_i32_1 = arith.constant 0 : i32
    return %c0_i32, %c0_i32_0 : i32, i32
  }
  func.func @transform_2(%arg0: i32, %arg1: i32, %arg2: i32) -> (i32, i32, i32) {
    %c0_i32 = arith.constant 0 : i32
    %c0_i32_0 = arith.constant 0 : i32
    return %arg0, %arg2, %c0_i32 : i32, i32, i32
  }
  func.func @transform_3(%arg0: i32, %arg1: i32, %arg2: i32) -> (i32, i32, i32) {
    %c0_i32 = arith.constant 0 : i32
    %c0_i32_0 = arith.constant 0 : i32
    return %arg0, %arg1, %c0_i32 : i32, i32, i32
  }
}

</mosaic_0001>

<bundles_post_ra>
// kernel: tpu_custom_call.1
= control target key start
LH: loop header
LB: loop body
LE: loop exit
PB: predicated region body
PF: predicated region fallthrough
CT: control target
= control target key end

     0   :  { %s1366_s0 = inlined_call_operand.hbm [shape: f32[2,8,128], index: 0, kind: input, shape index: {}]   ;;  %s1367_s1 = inlined_call_operand.hbm [shape: f32[128,128], index: 1, kind: input, shape index: {}]   ;;  %s1368_s2 = inlined_call_operand.hbm [shape: f32[2,8,128], index: 2, kind: input, shape index: {}]   ;;  %s1369_s3 = inlined_call_operand.hbm [shape: f32[2,8,128], index: 3, kind: output, shape index: {}]  }
   0x1   :  { %1375 = sst [smem:[#allocation17_spill]] %s1366_s0 }
   0x2   :  { %8 = vsyncpa [#allocation7], 0 }
   0x3   :  { %10 = vsyncpa [#allocation7 + $0x1], 0 }
   0x4   :  { %11 = vsyncpa [#allocation10], 0 }
   0x5   :  { %12 = vsyncpa [#allocation8], 0 }
   0x6   :  { %14 = vsyncpa [#allocation8 + $0x1], 0  ;;  %s1093_s12 = smov 0   ;;  %s1095_s13 = smov 0  }
   0x7   :  { %s1097_s14 = smov 0   ;;  %s1099_s15 = smov 0  }
   0x8   :  { %s1101_s16 = smov 0   ;;  %s1103_s17 = smov 0  }
   0x9 LB: > { %s39_s18 = sadd.s32 1, %s1056_s16  ;;  %s48_s19 = sadd.s32 1, %s1048_s14  ;;  %s1060_s17 = sphi %s1103_s17, %s20_s17   ;;  %s1056_s16 = sphi %s1101_s16, %s1395_s16   ;;  %s1052_s15 = sphi %s1099_s15, %s1394_s15   ;;  %s1048_s14 = sphi %s1097_s14, %s1393_s14   ;;  %s1044_s13 = sphi %s1095_s13, %s1392_s13   ;;  %s1040_s12 = sphi %s1093_s12, %s1391_s12  }
   0xa   : > { %p41_p0 = scmp.ge.s32.totalorder %s39_s18, 2  ;;  %p55_p1 = scmp.ne.s32.totalorder %s1048_s14, %s1044_s13 }
   0xb   : > { %p56_p2 = scmp.eq.s32.totalorder %s1060_s17, 0  ;;  %p815_p5 = scmp.lt.s32.totalorder %s1060_s17, 2 }
   0xc   : > { %s1397_s18 = smov (%p41_p0, %s39_s18), 0  ;;  %s175_s21 = sand.u32 1, %s1060_s17  }
   0xd   : > { %p57_p4 = por %p56_p2, %p55_p1  ;;  %s43_s20 = ssub.s32 %s1056_s16, %s1397_s18 }
   0xe   : > { %p46_p6 = scmp.eq.s32.totalorder %s43_s20, 0  ;;  %s177_s22 = sand.u32 1, %s1048_s14  }
   0xf   : > { %s686_s23 = sshll.u32 %s1056_s16, 7  ;;  %s1143_s25 = sshll.u32 %s177_s22, 3 }
  0x10   : > { %s1141_s24 = scalar_select %p46_p6, %s1048_s14, %s48_s19  }
  0x11   : > { %s1376_s0 = sld [smem:[#allocation17_spill]]  ;;  %p1152_p7 = pnand %p815_p5, %p57_p4 }
  0x12   : > { %s179_s30 = scalar_lea.vmem [#allocation6], %s1143_s25  ;;  %s1159_s5 = scalar_lea.sflag [#allocation7], %s175_s21 }
  0x13   : > { %s187_s4 = sshll.u32 %s179_s30, 4  ;;  %p884_p9 = pneg %p1152_p7  ;;  %s1157_s4 = int_to_ptr.vmem [resolvable:$true] %s187_s4 }
  0x17   : > { %s1150_s28 = scalar_lea.hbm %s1376_s0, %s686_s23  ;;  %s887_s9 = scalar_lea.hbm %s1376_s0, 256 }
  0x18   : > { %s882_s6 = scalar_lea.hbm %s1150_s28, 128  ;;  %p888_p12 = scmp.lt.u32.totalorder %s1150_s28, %s1376_s0 }
  0x19   : > { %p883_p8 = scmp.ne.s32.totalorder %s1150_s28, %s882_s6  ;;  %p889_p13 = scmp.lt.u32.totalorder %s887_s9, %s882_s6 }
  0x1a   : > { %p891_p2 = scmp.lt.u32.totalorder %s882_s6, %s1150_s28 }
  0x1b   : > { %p885_p10 = pnand %p884_p9, %p883_p8  ;;  %p890_p0 = por %p889_p13, %p888_p12 }
  0x1d   : > { %p886_p11 = pneg %p885_p10  ;;  %p892_p4 = por %p891_p2, %p890_p0 }
  0x1f   : > { %p893_p5 = pnand %p892_p4, %p886_p11 }
  0x21   : > { %896 = shalt.err (!%p893_p5)
}
  0x22   : > { %s897_s19 = scalar_lea.vmem %s1157_s4, 128  ;;  %s1062_s20 = smov [#allocation6]  }
  0x23   : > { %p898_p6 = scmp.ne.s32.totalorder %s1157_s4, %s897_s19  ;;  %s902_s21 = sshll.u32 %s1062_s20, 4  ;;  %s903_s21 = int_to_ptr.vmem [resolvable:$false] %s902_s21 }
  0x24   : > { %s904_s22 = scalar_lea.vmem %s903_s21, 256  ;;  %p905_p3 = scmp.lt.s32.totalorder %s1157_s4, %s903_s21 }
  0x25   : > { %p900_p8 = pnand %p898_p6, %p884_p9  ;;  %p906_p12 = scmp.lt.s32.totalorder %s904_s22, %s897_s19 }
  0x27   : > { %p901_p10 = pneg %p900_p8  ;;  %p907_p13 = por %p906_p12, %p905_p3 }
  0x29   : > { %p908_p0 = pnand %p907_p13, %p901_p10 }
  0x2b   : > { %911 = shalt.err (!%p908_p0)
}
  0x2c   : > { %806 = dma.hbm_to_vmem [thread:$0]  (!%p1152_p7), %s1150_s28, 128, %s1157_s4, %s1159_s5  }
  0x2d   : > { %s1188_s26 = sadd.s32 4294967295, %s1060_s17   ;;  %s681_s27 = sadd.s32 4294967294, %s1060_s17  }
  0x2e   : > { %p61_p3 = scmp.ne.s32.totalorder %s1044_s13, %s1040_s12  ;;  %p1370_p11 = scmp.eq.s32.totalorder %s1188_s26, 0 }
  0x2f   : > { %p136_p2 = scmp.eq.s32.totalorder %s1188_s26, 1  ;;  %p142_p4 = scmp.eq.s32.totalorder %s681_s27, 1 }
  0x30   : > { %p682_p5 = scmp.ge.s32.totalorder %s1060_s17, 1  ;;  %p1198_p6 = por %p1370_p11, %p61_p3 }
  0x31   : > { %p1205_p8 = por %p136_p2, %p55_p1  ;;  %p1209_p10 = por %p142_p4, %p61_p3 }
  0x32   : > { %s1378_s30 = scalar_select %p1198_p6, 1, 0 }
  0x33   : > { %s1379_s28 = scalar_select %p1205_p8, 1, 0 }
  0x34   : > { %s1380_s4 = scalar_select %p1209_p10, 1, 0 }
  0x35   : > { %p149_p12 = scmp.lt.s32.totalorder %s1060_s17, 3  ;;  %s1063_s7 = smov [#allocation9]  }
  0x36   : > { %s161_s8 = sshll.u32 %s1063_s7, 4  ;;  %s1223_s11 = scalar_lea.hbm %s1368_s2, %s686_s23  ;;  %s1225_s8 = int_to_ptr.vmem [resolvable:$true] %s161_s8 }
  0x37   : > { %p1214_p13 = pnand %p682_p5, %p149_p12  ;;  %s198_s19 = scalar_lea.vmem [#allocation11], %s1143_s25 }
  0x38   : > { %s206_s20 = sshll.u32 %s198_s19, 4  ;;  %s912_s22 = scalar_lea.hbm %s1223_s11, 128  ;;  %s207_s20 = int_to_ptr.vmem [resolvable:$true] %s206_s20 }
  0x39   : > { %s1381_s6 = scalar_select %p1214_p13, 1, 0 }
  0x3a   : > { %p799_p1 = pneg %p1214_p13  ;;  %p913_p3 = scmp.ne.s32.totalorder %s1223_s11, %s912_s22 }
  0x3b   : > { %s917_s7 = scalar_lea.hbm %s1368_s2, 256  ;;  %p918_p5 = scmp.lt.u32.totalorder %s1223_s11, %s1368_s2 }
  0x3c   : > { %p1232_p0 = pnand %p799_p1, %p1370_p11  ;;  %p915_p2 = pnand %p913_p3, %p884_p9 }
  0x3d   : > { %p919_p12 = scmp.lt.u32.totalorder %s917_s7, %s912_s22  ;;  %p921_p11 = scmp.lt.u32.totalorder %s912_s22, %s1223_s11 }
  0x3e   : > { %s1382_s21 = scalar_select %p1232_p0, 1, 0 }
  0x3f   : > { %p916_p4 = pneg %p915_p2  ;;  %p920_p1 = por %p919_p12, %p918_p5 }
  0x41   : > { %p922_p10 = por %p921_p11, %p920_p1 }
  0x43   : > { %p923_p8 = pnand %p922_p10, %p916_p4 }
  0x45   : > { %926 = shalt.err (!%p923_p8)
}
  0x46   : > { %s927_s25 = scalar_lea.vmem %s207_s20, 128  ;;  %s1064_s19 = smov [#allocation11]  }
  0x47   : > { %p928_p6 = scmp.ne.s32.totalorder %s207_s20, %s927_s25  ;;  %s932_s23 = sshll.u32 %s1064_s19, 4  ;;  %s933_s23 = int_to_ptr.vmem [resolvable:$false] %s932_s23 }
  0x48   : > { %s934_s27 = scalar_lea.vmem %s933_s23, 256  ;;  %p935_p13 = scmp.lt.s32.totalorder %s207_s20, %s933_s23 }
  0x49   : > { %p930_p3 = pnand %p928_p6, %p884_p9  ;;  %p936_p0 = scmp.lt.s32.totalorder %s934_s27, %s927_s25 }
  0x4b   : > { %p931_p2 = pneg %p930_p3  ;;  %p937_p5 = por %p936_p0, %p935_p13 }
  0x4d   : > { %p938_p12 = pnand %p937_p5, %p931_p2 }
  0x4f   : > { %941 = shalt.err (!%p938_p12)
}
  0x50   : > { %809 = dma.hbm_to_vmem [thread:$0]  (!%p1152_p7), %s1223_s11, 128, %s207_s20, %s1159_s5  }
  0x51   : > { %s942_s9 = scalar_lea.hbm %s1367_s1, 2048  ;;  %p1383_p11 = scmp.ne.s32.totalorder %s1382_s21, 0 }
  0x52   : > { %p943_p9 = scmp.ne.s32.totalorder %s1367_s1, %s942_s9  ;;  %p949_p13 = scmp.lt.u32.totalorder %s942_s9, %s1367_s1 }
  0x53   : > { %p944_p6 = pneg %p1383_p11 }
  0x55   : > { %p945_p8 = pnand %p944_p6, %p943_p9 }
  0x57   : > { %p946_p10 = pneg %p945_p8 }
  0x59   : > { %p951_p0 = pnand %p949_p13, %p946_p10 }
  0x5b   : > { %954 = shalt.err (!%p951_p0)
}
  0x5c   : > { %s955_s29 = scalar_lea.vmem %s1225_s8, 2048  ;;  %p963_p3 = scmp.lt.s32.totalorder %s1225_s8, %s1225_s8 }
  0x5d   : > { %p956_p7 = scmp.ne.s32.totalorder %s1225_s8, %s955_s29  ;;  %p964_p2 = scmp.lt.s32.totalorder %s955_s29, %s955_s29 }
  0x5f   : > { %p958_p4 = pnand %p956_p7, %p944_p6  ;;  %p965_p5 = por %p964_p2, %p963_p3 }
  0x61   : > { %p959_p1 = pneg %p958_p4 }
  0x63   : > { %p966_p12 = pnand %p965_p5, %p959_p1 }
  0x65   : > { %969 = shalt.err (!%p966_p12)
}
  0x66   : > { %s1065_s0 = smov 128   ;;  %s1066_s5 = smov 8  }
  0x67   : > { %802 = dma.hbm_to_vmem [thread:$0]  (!%p1383_p11), %s1367_s1, 2048, %s1225_s8, [#allocation10], %s1065_s0, %s1065_s0, %s1066_s5  }
  0x68   : > { %p1384_p9 = scmp.ne.s32.totalorder %s1381_s6, 0 }
  0x69   : > { %s217_s23 = sand.u32 (!%p1384_p9), 1, %s1188_s26   ;;  %s219_s27 = sand.u32 (!%p1384_p9), 1, %s1044_s13  }
  0x6a   : > { %215 = sbr.rel (%p1384_p9) target bundleno = 1174 (0x496), region = 32  ;;  %s1283_s22 = sshll.u32 (!%p1384_p9), %s219_s27, 3 }
  0x6b   : > { %s218_s7 = scalar_lea.sflag (!%p1384_p9), [#allocation7], %s217_s23  ;;  %s221_s9 = scalar_lea.vmem (!%p1384_p9), [#allocation6], %s1283_s22 }
  0x6c   : > { %p1385_p6 = scmp.ne.s32.totalorder (!%p1384_p9), %s1378_s30, 0 }
  0x71   : > { %1023 = dma.done.wait (%p1385_p6), %s218_s7, 128  }
  0x72   : > { %1025 = vsyncadd (%p1385_p6), %s218_s7, 4294967168  ;;  %p1386_p11 = scmp.eq.s32.totalorder %s1188_s26, 0 }
  0x74   : > { %1027 = dma.done.wait (%p1386_p11), [#allocation10], 2048   ;;  %p1387_p8 = pmov %p1386_p11 }
  0x75   : > { %s234_s6 = scalar_lea.vmem [#allocation11], %s1283_s22 }
  0x76   : > { %1029 = vsyncadd (%p1387_p8), [#allocation10], 4294965248 }
  0x77   : > { %1031 = dma.done.wait (%p1385_p6), %s218_s7, 128  }
  0x78   : > { %1033 = vsyncadd (%p1385_p6), %s218_s7, 4294967168  ;;  %v1067_v0 = vmov 0.0|0.0   ;;  %vm1068_vm0 = vmmov 0   ;;  %v1069_v1 = vmov 0.0   ;;  %v271_v2 = vld [vmem:[#allocation9] sm:$0xff]  ;;  %v272_v3 = vld [vmem:[#allocation9 + $0x8] sm:$0xff] }
  0x79   : > { %765 = vmatprep.subr.bf16.mxu0 %v1067_v0  ;;  %752 = vmatprep.mubr.msk.f32.mxu0 %vm1068_vm0, %v1069_v1  ;;  %v273_v4 = vld [vmem:[#allocation9 + $0x10] sm:$0xff]  ;;  %v766_v5 = vpack.c.bf16 %v272_v3, %v271_v2  ;;  %v274_v6 = vld [vmem:[#allocation9 + $0x18] sm:$0xff]  ;;  %v275_v8 = vld [vmem:[#allocation9 + $0x20] sm:$0xff]  ;;  %vm266_vm1 = vcmask 7168   ;;  %v1070_v30 = vmov -inf   ;;  %vm431_vm2 = vcmask 64512  }
  0x7a   : > { %755 = vmatprep.subr.mxu1 %v1069_v1  ;;  %757 = vmatprep.mubr.msk.f32.mxu1 %vm1068_vm0, %v1069_v1  ;;  %v769_v7 = vpack.c.bf16 %v274_v6, %v273_v4  ;;  %v276_v9 = vld [vmem:[#allocation9 + $0x28] sm:$0xff]  ;;  %v277_v12 = vld [vmem:[#allocation9 + $0x30] sm:$0xff]  ;;  %v278_v13 = vld [vmem:[#allocation9 + $0x38] sm:$0xff]  ;;  %267 = vst.msk [vmem:[#allocation3] sm:$0xff] %vm266_vm1, %v1070_v30  ;;  %v1071_v34 = vmov 0   ;;  %s696_s26 = sshll.u32 %s1052_s15, 7 }
  0x7b   : > { %767 = vmatpush3.bf16.msra.mxu0 %v766_v5  ;;  %v358_v10 = vld [vmem:[%s234_s6] sm:$0xff]  ;;  %v772_v11 = vpack.c.bf16 %v276_v9, %v275_v8  ;;  %v775_v14 = vpack.c.bf16 %v278_v13, %v277_v12  ;;  %v281_v18 = vld [vmem:[#allocation9 + $0x50] sm:$0xff]  ;;  %v282_v19 = vld [vmem:[#allocation9 + $0x58] sm:$0xff]  ;;  %268 = vst.msk [vmem:[#allocation4] sm:$0xff] %vm266_vm1, %v1069_v1  ;;  %874 = vset.pattern.permute.xlu0 %v1071_v34  ;;  %s261_s30 = scalar_lea.vmem [#allocation12], %s1283_s22  ;;  %s1316_s25 = scalar_lea.hbm %s1369_s3, %s696_s26 }
  0x7c   : > { %768 = vmatprep.subr.bf16.mxu0 %v1067_v0  ;;  %756 = vmatpush3.xpose.msra.mxu1 %v358_v10  ;;  %v279_v15 = vld [vmem:[#allocation9 + $0x40] sm:$0xff]  ;;  %v280_v16 = vld [vmem:[#allocation9 + $0x48] sm:$0xff]  ;;  %v781_v20 = vpack.c.bf16 %v282_v19, %v281_v18  ;;  %v285_v24 = vld [vmem:[#allocation9 + $0x70] sm:$0xff]  ;;  %s566_s8 = sshll.u32 %s261_s30, 4  ;;  %s552_s19 = scalar_lea.sflag [#allocation8], %s219_s27  ;;  %s1318_s8 = int_to_ptr.vmem [resolvable:$true] %s566_s8 }
  0x7d   : > { %760 = vmatprep.subr.mxu1 %v1069_v1  ;;  %v778_v17 = vpack.c.bf16 %v280_v16, %v279_v15  ;;  %v283_v21 = vld [vmem:[#allocation9 + $0x60] sm:$0xff]  ;;  %v284_v22 = vld [vmem:[#allocation9 + $0x68] sm:$0xff]  ;;  %v286_v25 = vld [vmem:[#allocation9 + $0x78] sm:$0xff]  ;;  %875 = vset.pattern.permute.xlu1 %v1071_v34  ;;  %s970_s29 = scalar_lea.vmem %s1318_s8, 128  ;;  %p1388_p13 = scmp.ne.s32.totalorder %s1379_s28, 0 }
  0x7e   : > { %v784_v23 = vpack.c.bf16 %v284_v22, %v283_v21  ;;  %v787_v26 = vpack.c.bf16 %v286_v25, %v285_v24  ;;  %v270_v27 = vld [vmem:[%s221_s9] sm:$0xff]  ;;  %p971_p10 = scmp.ne.s32.totalorder %s1318_s8, %s970_s29  ;;  %s1072_s15 = smov [#allocation12]  }
  0x7f   : > { %770 = vmatpush3.bf16.msra.mxu0 %v769_v7  ;;  %s974_s0 = sshll.u32 %s1072_s15, 4  ;;  %s975_s0 = int_to_ptr.vmem [resolvable:$false] %s974_s0 }
  0x80   : > { %771 = vmatprep.subr.bf16.mxu0 %v1067_v0  ;;  %p972_p0 = pnand %p971_p10, %p1388_p13  ;;  %s976_s5 = scalar_lea.vmem %s975_s0, 256 }
  0x81   : > { %v430_v35 = vld [vmem:[#allocation3] sm:$0xff]  ;;  %p977_p4 = scmp.lt.s32.totalorder %s1318_s8, %s975_s0  ;;  %p978_p1 = scmp.lt.s32.totalorder %s976_s5, %s970_s29 }
  0x82   : > { %v447_v46 = vld [vmem:[#allocation4] sm:$0xff]  ;;  %p973_p7 = pneg %p972_p0 }
  0x83   : > { %773 = vmatpush3.bf16.msra.mxu0 %v772_v11  ;;  %p979_p3 = por %p978_p1, %p977_p4 }
  0x84   : > { %774 = vmatprep.subr.bf16.mxu0 %v1067_v0 }
  0x85   : > { %p980_p2 = pnand %p979_p3, %p973_p7 }
  0x87   : > { %776 = vmatpush3.bf16.msra.mxu0 %v775_v14 }
  0x88   : > { %777 = vmatprep.subr.bf16.mxu0 %v1067_v0 }
  0x8b   : > { %779 = vmatpush3.bf16.msra.mxu0 %v778_v17 }
  0x8c   : > { %780 = vmatprep.subr.bf16.mxu0 %v1067_v0 }
  0x8f   : > { %782 = vmatpush3.bf16.msra.mxu0 %v781_v20 }
  0x90   : > { %783 = vmatprep.subr.bf16.mxu0 %v1067_v0 }
  0x93   : > { %785 = vmatpush3.bf16.msra.mxu0 %v784_v23 }
  0x94   : > { %786 = vmatprep.subr.bf16.mxu0 %v1067_v0 }
  0x97   : > { %788 = vmatpush3.bf16.msra.mxu0 %v787_v26 }
  0x9a   : > { %753 = vmatmul.mubr.f32.vlgmr.msra.gmra.mrb[0].mxu0 %v270_v27 }
 0x16d   : > { %v353_v28 = vpop.f32.mrb[0].mxu0 }
 0x16e   : > { %v754_v29 = vpop.f32.mrb[1].mxu0  ;;  %758 = vmatmul.mubr.f32.vlgmr.msra.gmra.mrb[0].mxu1 %v353_v28 }
 0x16f   : > { %761 = vmatpush3.msra.mxu1 %v358_v10  ;;  %762 = vmatprep.mubr.msk.f32.mxu1 %vm1068_vm0, %v1069_v1 }
 0x241   : > { %v426_v31 = vpop.f32.mrb[0].mxu1 }
 0x242   : > { %v759_v32 = vpop.f32.mrb[1].mxu1  ;;  %v432_v33 = vsel %vm431_vm2, %v426_v31, -inf }
 0x243   : > { %433 = vmax.xlane.f32.xlu0 %v432_v33 }
 0x2d0   : > { %v434_v36 = vpop.xlane.xlu0 %433 }
 0x2d1   : > { %v435_v37 = vmax.f32 %v430_v35, %v434_v36 }
 0x2d3   : > { %v436_v38 = vsub.f32 %v430_v35, %v435_v37  ;;  %537 = vst.msk [vmem:[#allocation3] sm:$0xff] %vm266_vm1, %v435_v37  ;;  %441 = vperm.xlu0 %874, %v435_v37  }
 0x2d5   : > { %v437_v44 = vmul.f32 1.442695, %v436_v38 }
 0x352   : > { %v442_v39 = vpop.permute.xlu0 %441 }
 0x353   : > { %v444_v40 = vsub.f32 %v426_v31, %v442_v39 }
 0x355   : > { %v445_v41 = vmul.f32 1.442695, %v444_v40 }
 0x357   : > { %876 = vpow2.f32 %v445_v41 }
 0x358   : > { %878 = vpow2.f32 %v437_v44 }
 0x361   : > { %v877_v42 = vpop.eup %876 }
 0x362   : > { %763 = vmatmul.mubr.msk.f32.vlgmr.msra.gmra.mrb[2].mxu1 %vm431_vm2, %v877_v42  ;;  %v449_v43 = vsel %vm431_vm2, %v877_v42, 0.0  ;;  %v879_v45 = vpop.eup %878 }
 0x363   : > { %450 = vadd.xlane.f32.xlu1 %v449_v43  ;;  %v448_v47 = vmul.f32 %v879_v45, %v447_v46 }
 0x3f0   : > { %v451_v48 = vpop.xlane.xlu1 %450 }
 0x3f1   : > { %v452_v49 = vadd.f32 %v451_v48, %v448_v47 }
 0x3f3   : > { %454 = vst.msk [vmem:[#allocation4] sm:$0xff] %vm266_vm1, %v452_v49 }
 0x3fa   : > { %v542_v50 = vld [vmem:[#allocation4] sm:$0xff] }
 0x3fb   : > { %545 = vperm.xlu1 %875, %v542_v50  }
 0x3ff   : > { %458 = vperm.xlu1 %875, %v879_v45  }
 0x435   : > { %v531_v51 = vpop.f32.mrb[2].mxu1 }
 0x436   : > { %v764_v52 = vpop.f32.mrb[3].mxu1 }
 0x47a   : > { %v546_v53 = vpop.permute.xlu1 %545 }
 0x47b   : > { %880 = vrcp.f32 %v546_v53 }
 0x47e   : > { %v459_v54 = vpop.permute.xlu1 %458 }
 0x47f   : > { %v461_v55 = vmul.f32 0.0, %v459_v54 }
 0x481   : > { %v535_v56 = vadd.f32 %v531_v51, %v461_v55 }
 0x485   : > { %v881_v57 = vpop.eup %880 }
 0x486   : > { %v549_v58 = vmul.f32 %v881_v57, %v535_v56 }
 0x488   : > { %550 = vst [vmem:[%s261_s30] sm:$0xff] %v549_v58 }
 0x489   : > { %983 = shalt.err (!%p980_p2)
}
 0x48a   : > { %s984_s11 = scalar_lea.hbm %s1316_s25, 128  ;;  %s988_s27 = scalar_lea.hbm %s1369_s3, 256 }
 0x48b   : > { %p985_p5 = scmp.ne.s32.totalorder %s1316_s25, %s984_s11  ;;  %p989_p6 = scmp.lt.u32.totalorder %s1316_s25, %s1369_s3 }
 0x48c   : > { %p990_p11 = scmp.lt.u32.totalorder %s988_s27, %s984_s11  ;;  %p992_p10 = scmp.lt.u32.totalorder %s984_s11, %s1316_s25 }
 0x48d   : > { %p986_p12 = pnand %p985_p5, %p1388_p13 }
 0x48e   : > { %p991_p8 = por %p990_p11, %p989_p6 }
 0x48f   : > { %p987_p9 = pneg %p986_p12 }
 0x490   : > { %p993_p0 = por %p992_p10, %p991_p8 }
 0x492   : > { %p994_p7 = pnand %p993_p0, %p987_p9 }
 0x494   : > { %997 = shalt.err (!%p994_p7)
}
 0x495   : > { %797 = dma.vmem_to_hbm [thread:$0]  (%p1388_p13), %s1318_s8, 128, %s1316_s25, %s552_s19  }
 0x496 PF: > { %s578_s9 = sand.u32 1, %s1040_s12   ;;  %p1389_p4 = scmp.ne.s32.totalorder %s1380_s4, 0 }
 0x497   : > { %p1390_p1 = scmp.ge.s32.totalorder %s1060_s17, 2  ;;  %s579_s6 = scalar_lea.sflag [#allocation8], %s578_s9 }
 0x499   : > { %p811_p3 = pnand %p1390_p1, %p1389_p4 }
 0x49b   : > { %1035 = dma.done.wait (!%p811_p3), %s579_s6, 128  }
 0x49c   : > { %1037 = vsyncadd (!%p811_p3), %s579_s6, 4294967168  ;;  %s20_s17 = sadd.s32 1, %s1060_s17   ;;  %s1391_s12 = smov %s1044_s13 }
 0x49d   : > { %p17_p2 = scmp.ge.s32.totalorder %s20_s17, 4   ;;  %s1392_s13 = smov %s1048_s14 }
 0x49e   : > { %s1393_s14 = smov %s1141_s24  ;;  %s1394_s15 = smov %s1056_s16 }
 0x49f   : > { %s1395_s16 = smov %s1397_s18  ;;  %19 = sbr.rel (!%p17_p2) target bundleno = 9 (0x9), region = 100 }
 0x4a6   :  { %584 = vsyncpa [#allocation7], 1 }
 0x4a7   :  { %586 = vsyncpa [#allocation7 + $0x1], 1 }
 0x4a8   :  { %587 = vsyncpa [#allocation10], 1 }
 0x4a9   :  { %588 = vsyncpa [#allocation8], 1 }
 0x4aa   :  { %590 = vsyncpa [#allocation8 + $0x1], 1 }

</bundles_post_ra>
